<compile_context>
chip_gen: v7x
topology: tpu7x:2x2x1
jax: 0.10.0
libtpu: 0.0.40
codegen_flags: <defaults>
</compile_context>

<pallas_src>
import functools

import jax
import jax.numpy as jnp
from jax.experimental import pallas as pl
from jax.experimental.pallas import tpu as pltpu


# ---------------------------------------------------------------------------
# Pallas kernel: fused SE layer for a block of B_N samples
# ---------------------------------------------------------------------------
def _se_kernel(x_ref, w1t_ref, b1_ref, w2t_ref, b2_ref, o_ref, *, inv_hw):
    """x:(B,C,HWp)  w1t:(C,MID) b1:(1,MID)  w2t:(MID,C) b2:(1,C)  o:(B,C,HWp).

    Math is done in f32 regardless of the streaming dtype; the cast back to the
    output dtype happens only at the final store.
    """
    x = x_ref[...]                                   # (B, C, HWp) native dtype
    xf = x.astype(jnp.float32)

    # AdaptiveAvgPool2d(1): mean over the flattened (zero-padded) spatial axis.
    # inv_hw uses the TRUE H*W, so zero padding does not bias the mean.
    pooled = jnp.sum(xf, axis=-1) * inv_hw           # (B, C) f32

    # reduce_conv (1x1 conv == FC over channels) + bias + ReLU
    h = jnp.dot(pooled, w1t_ref[...],
                preferred_element_type=jnp.float32) + b1_ref[...]   # (B, MID)
    h = jnp.maximum(h, 0.0)

    # expand_conv (1x1 conv == FC over channels) + bias
    a = jnp.dot(h, w2t_ref[...],
                preferred_element_type=jnp.float32) + b2_ref[...]   # (B, C)

    # F.hardsigmoid(a) = clamp(a/6 + 1/2, 0, 1)
    attn = jnp.clip(a * (1.0 / 6.0) + 0.5, 0.0, 1.0)                # (B, C)

    # Channel-wise rescale; (B, C, 1) broadcasts along the lane (spatial) dim.
    o_ref[...] = (xf * attn[:, :, None]).astype(o_ref.dtype)


# ---------------------------------------------------------------------------
# Block-size heuristic
# ---------------------------------------------------------------------------
_TARGET_BLOCK_BYTES = 2 * 1024 * 1024   # ~2 MiB x-block => in+out double-buffered
                                        # ~8 MiB, fits every chip's scoped-VMEM
                                        # default (v5e 16 MiB, v6e/v7x 32 MiB).
_MIN_GRID_STEPS = 8                     # keep >= 8 grid steps when N allows so
                                        # both v7x TensorCores can pipeline.


def _choose_batch_block(n, per_sample_bytes):
    cap_bytes = max(1, _TARGET_BLOCK_BYTES // max(per_sample_bytes, 1))
    cap_grid = max(1, n // _MIN_GRID_STEPS)
    bn = max(1, min(n, cap_bytes, cap_grid))
    while n % bn:          # keep full (unmasked) blocks: bn must divide N
        bn -= 1
    return bn


# ---------------------------------------------------------------------------
# Wrapper: layout plumbing + pallas_call
# ---------------------------------------------------------------------------
def se_layer_pallas(x, w1, b1, w2, b2):
    """SELayer.forward.

    x : (N, C, H, W)  NCHW, like PyTorch (output keeps x.dtype)
    w1: (MID, C, 1, 1), b1: (MID,)   -- reduce_conv
    w2: (C, MID, 1, 1), b2: (C,)     -- expand_conv
    """
    N, C, H, W = x.shape
    MID = w1.shape[0]
    HW = H * W

    # Lane-dense spatial axis: pad HW up to a multiple of 128 (no-op when it
    # already is one, e.g. 16x16=256).  Zero pad is pooling-safe (true 1/HW
    # scale in the kernel) and padded lanes are sliced off afterwards.
    HWp = pl.cdiv(HW, 128) * 128
    x3 = x.reshape(N, C, HW)                 # native dtype, no extra HBM copy
    if HWp != HW:
        x3 = jnp.pad(x3, ((0, 0), (0, 0), (0, HWp - HW)))

    # Tiny FC weights: keep in f32 and pre-transpose so the kernel does
    # (B, C) @ (C, MID) and (B, MID) @ (MID, C) with no in-kernel transposes.
    w1t = w1.reshape(MID, C).T.astype(jnp.float32)      # (C, MID)
    b1m = b1.reshape(1, MID).astype(jnp.float32)
    w2t = w2.reshape(C, MID).T.astype(jnp.float32)      # (MID, C)
    b2m = b2.reshape(1, C).astype(jnp.float32)

    bn = _choose_batch_block(N, C * HWp * x.dtype.itemsize)
    grid = (N // bn,)

    kernel = functools.partial(_se_kernel, inv_hw=1.0 / HW)

    out3 = pl.pallas_call(
        kernel,
        grid=grid,
        in_specs=[
            pl.BlockSpec((bn, C, HWp), lambda n: (n, 0, 0)),   # x block
            pl.BlockSpec((C, MID), lambda n: (0, 0)),          # reduce weight^T
            pl.BlockSpec((1, MID), lambda n: (0, 0)),          # reduce bias
            pl.BlockSpec((MID, C), lambda n: (0, 0)),          # expand weight^T
            pl.BlockSpec((1, C), lambda n: (0, 0)),            # expand bias
        ],
        out_specs=pl.BlockSpec((bn, C, HWp), lambda n: (n, 0, 0)),
        out_shape=jax.ShapeDtypeStruct((N, C, HWp), x.dtype),
        compiler_params=pltpu.CompilerParams(
            dimension_semantics=("parallel",)),
    )(x3, w1t, b1m, w2t, b2m)

    if HWp != HW:
        out3 = out3[:, :, :HW]
    return out3.reshape(N, C, H, W)


# ---------------------------------------------------------------------------
# Pure-JAX reference for correctness
# ---------------------------------------------------------------------------
def se_layer_ref(x, w1, b1, w2, b2):
    N, C, H, W = x.shape
    MID = w1.shape[0]
    pooled = jnp.mean(x, axis=(2, 3))                                   # (N, C)
    h = jnp.dot(pooled, w1.reshape(MID, C).T,
                precision=jax.lax.Precision.HIGHEST) + b1               # (N, MID)
    h = jnp.maximum(h, 0.0)
    a = jnp.dot(h, w2.reshape(C, MID).T,
                precision=jax.lax.Precision.HIGHEST) + b2               # (N, C)
    attn = jnp.clip(a / 6.0 + 0.5, 0.0, 1.0)                            # hardsigmoid
    return x * attn[:, :, None, None]


# ---------------------------------------------------------------------------
if __name__ == "__main__":
    master_key = jax.random.PRNGKey(0)

    def run_case(key, N, C, H, W, dtype, tol, reduction=4, min_dim=16):
        MID = max(int(round(C / reduction)), min_dim)
        kx, kw1, kb1, kw2, kb2 = jax.random.split(key, 5)
        x = jax.random.normal(kx, (N, C, H, W), dtype)
        w1 = jax.random.normal(kw1, (MID, C, 1, 1), jnp.float32) * 0.1
        b1 = jax.random.normal(kb1, (MID,), jnp.float32) * 0.1
        w2 = jax.random.normal(kw2, (C, MID, 1, 1), jnp.float32) * 0.1
        b2 = jax.random.normal(kb2, (C,), jnp.float32) * 0.1

        out = jax.block_until_ready(se_layer_pallas(x, w1, b1, w2, b2))
        ref = se_layer_ref(x.astype(jnp.float32), w1, b1, w2, b2)

        assert out.shape == ref.shape == (N, C, H, W), (out.shape, ref.shape)
        assert out.dtype == x.dtype, (out.dtype, x.dtype)
        err = float(jnp.max(jnp.abs(out.astype(jnp.float32) - ref)))
        assert err <= tol, (
            f"max abs err = {err} for N={N} C={C} H={H} W={W} dtype={dtype}")

    keys = jax.random.split(master_key, 4)
    # Default SELayer shape from the spec (mid = max(round(64/4), 16) = 16).
    run_case(keys[0], 2, 64, 16, 16, jnp.float32, 1e-3)
    # Larger batch: exercises the batched (B_N > 1) block path, grid of 8 steps.
    run_case(keys[1], 16, 64, 16, 16, jnp.float32, 1e-3)
    # Native bf16 streaming: output stays bf16, math in f32 inside the kernel.
    run_case(keys[2], 8, 64, 16, 16, jnp.bfloat16, 2e-2)
    # Non-128-multiple spatial (7x7=49): exercises the lane-padding guard.
    run_case(keys[3], 4, 32, 7, 7, jnp.float32, 1e-3)

    print("KERNEL_OK")
</pallas_src>

<mosaic_0001>
module attributes {stable_mosaic.version = 11 : i64} {
  func.func @_se_kernel(%arg0: i32, %arg1: memref<1x64x256xf32, #tpu.memory_space<vmem>>, %arg2: memref<64x16xf32, #tpu.memory_space<vmem>>, %arg3: memref<1x16xf32, #tpu.memory_space<vmem>>, %arg4: memref<16x64xf32, #tpu.memory_space<vmem>>, %arg5: memref<1x64xf32, #tpu.memory_space<vmem>>, %arg6: memref<1x64x256xf32, #tpu.memory_space<vmem>>) attributes {dimension_semantics = [#tpu.dimension_semantics<parallel>], iteration_bounds = array<i64: 2>, scalar_prefetch = 0 : i64, scratch_operands = 0 : i64, tpu.core_type = #tpu.core_type<tc>, window_params = [{transform_indices = @transform_0, window_bounds = array<i64: 1, 64, 256>}, {pipeline_mode = #tpu.pipeline_mode<synchronous>, transform_indices = @transform_1, window_bounds = array<i64: 64, 16>}, {pipeline_mode = #tpu.pipeline_mode<synchronous>, transform_indices = @transform_2, window_bounds = array<i64: 1, 16>}, {pipeline_mode = #tpu.pipeline_mode<synchronous>, transform_indices = @transform_3, window_bounds = array<i64: 16, 64>}, {pipeline_mode = #tpu.pipeline_mode<synchronous>, transform_indices = @transform_4, window_bounds = array<i64: 1, 64>}, {transform_indices = @transform_5, window_bounds = array<i64: 1, 64, 256>}]} {
    %c0 = arith.constant 0 : index
    %c0_0 = arith.constant 0 : index
    %c0_1 = arith.constant 0 : index
    %0 = vector.load %arg1[%c0, %c0_0, %c0_1] : memref<1x64x256xf32, #tpu.memory_space<vmem>>, vector<1x64x256xf32>
    %cst = arith.constant dense<0.000000e+00> : vector<1x64xf32>
    %1 = vector.multi_reduction <add>, %0, %cst [2] : vector<1x64x256xf32> to vector<1x64xf32>
    %cst_2 = arith.constant 3.906250e-03 : f32
    %2 = vector.broadcast %cst_2 : f32 to vector<1x64xf32>
    %3 = arith.mulf %1, %2 : vector<1x64xf32>
    %c0_3 = arith.constant 0 : index
    %c0_4 = arith.constant 0 : index
    %4 = vector.load %arg2[%c0_3, %c0_4] : memref<64x16xf32, #tpu.memory_space<vmem>>, vector<64x16xf32>
    %cst_5 = arith.constant dense<0.000000e+00> : vector<1x16xf32>
    %5 = tpu.matmul %3, %4, %cst_5 {dimension_numbers = #tpu.dot_dimension_numbers<[1], [0], [0], [1], [0, 0, 1, 1], [], []>} : vector<1x64xf32>, vector<64x16xf32>, vector<1x16xf32> -> vector<1x16xf32>
    %c0_6 = arith.constant 0 : index
    %c0_7 = arith.constant 0 : index
    %6 = vector.load %arg3[%c0_6, %c0_7] : memref<1x16xf32, #tpu.memory_space<vmem>>, vector<1x16xf32>
    %7 = arith.addf %5, %6 : vector<1x16xf32>
    %cst_8 = arith.constant 0.000000e+00 : f32
    %8 = vector.broadcast %cst_8 : f32 to vector<1x16xf32>
    %9 = arith.maximumf %7, %8 : vector<1x16xf32>
    %c0_9 = arith.constant 0 : index
    %c0_10 = arith.constant 0 : index
    %10 = vector.load %arg4[%c0_9, %c0_10] : memref<16x64xf32, #tpu.memory_space<vmem>>, vector<16x64xf32>
    %cst_11 = arith.constant dense<0.000000e+00> : vector<1x64xf32>
    %11 = tpu.matmul %9, %10, %cst_11 {dimension_numbers = #tpu.dot_dimension_numbers<[1], [0], [0], [1], [0, 0, 1, 1], [], []>} : vector<1x16xf32>, vector<16x64xf32>, vector<1x64xf32> -> vector<1x64xf32>
    %c0_12 = arith.constant 0 : index
    %c0_13 = arith.constant 0 : index
    %12 = vector.load %arg5[%c0_12, %c0_13] : memref<1x64xf32, #tpu.memory_space<vmem>>, vector<1x64xf32>
    %13 = arith.addf %11, %12 : vector<1x64xf32>
    %cst_14 = arith.constant 0.166666672 : f32
    %14 = vector.broadcast %cst_14 : f32 to vector<1x64xf32>
    %15 = arith.mulf %13, %14 : vector<1x64xf32>
    %cst_15 = arith.constant 5.000000e-01 : f32
    %16 = vector.broadcast %cst_15 : f32 to vector<1x64xf32>
    %17 = arith.addf %15, %16 : vector<1x64xf32>
    %cst_16 = arith.constant 0.000000e+00 : f32
    %cst_17 = arith.constant 1.000000e+00 : f32
    %18 = vector.broadcast %cst_16 : f32 to vector<1x64xf32>
    %19 = arith.maximumf %18, %17 : vector<1x64xf32>
    %20 = vector.broadcast %cst_17 : f32 to vector<1x64xf32>
    %21 = arith.minimumf %20, %19 : vector<1x64xf32>
    %22 = vector.shape_cast %21 : vector<1x64xf32> to vector<1x64x1xf32>
    %23 = vector.broadcast %22 : vector<1x64x1xf32> to vector<1x64x256xf32>
    %24 = arith.mulf %0, %23 : vector<1x64x256xf32>
    %c0_18 = arith.constant 0 : index
    %c0_19 = arith.constant 0 : index
    %c0_20 = arith.constant 0 : index
    %25 = vector.load %arg6[%c0_18, %c0_19, %c0_20] : memref<1x64x256xf32, #tpu.memory_space<vmem>>, vector<1x64x256xf32>
    tpu.vector_store %arg6[%c0_18, %c0_19, %c0_20], %24 {strides = array<i32>} : memref<1x64x256xf32, #tpu.memory_space<vmem>>, vector<1x64x256xf32>,
    return
  }
  func.func @transform_0(%arg0: i32) -> (i32, i32, i32) {
    %c0_i32 = arith.constant 0 : i32
    %c0_i32_0 = arith.constant 0 : i32
    %c0_i32_1 = arith.constant 0 : i32
    return %arg0, %c0_i32, %c0_i32_0 : i32, i32, i32
  }
  func.func @transform_1(%arg0: i32) -> (i32, i32) {
    %c0_i32 = arith.constant 0 : i32
    %c0_i32_0 = arith.constant 0 : i32
    %c0_i32_1 = arith.constant 0 : i32
    return %c0_i32, %c0_i32_0 : i32, i32
  }
  func.func @transform_2(%arg0: i32) -> (i32, i32) {
    %c0_i32 = arith.constant 0 : i32
    %c0_i32_0 = arith.constant 0 : i32
    %c0_i32_1 = arith.constant 0 : i32
    return %c0_i32, %c0_i32_0 : i32, i32
  }
  func.func @transform_3(%arg0: i32) -> (i32, i32) {
    %c0_i32 = arith.constant 0 : i32
    %c0_i32_0 = arith.constant 0 : i32
    %c0_i32_1 = arith.constant 0 : i32
    return %c0_i32, %c0_i32_0 : i32, i32
  }
  func.func @transform_4(%arg0: i32) -> (i32, i32) {
    %c0_i32 = arith.constant 0 : i32
    %c0_i32_0 = arith.constant 0 : i32
    %c0_i32_1 = arith.constant 0 : i32
    return %c0_i32, %c0_i32_0 : i32, i32
  }
  func.func @transform_5(%arg0: i32) -> (i32, i32, i32) {
    %c0_i32 = arith.constant 0 : i32
    %c0_i32_0 = arith.constant 0 : i32
    %c0_i32_1 = arith.constant 0 : i32
    return %arg0, %c0_i32, %c0_i32_0 : i32, i32, i32
  }
}

</mosaic_0001>

<bundles_post_ra>
// kernel: tpu_custom_call.1
= control target key start
LH: loop header
LB: loop body
LE: loop exit
PB: predicated region body
PF: predicated region fallthrough
CT: control target
= control target key end

     0   :  { %10 = vsyncpa [#allocation3], 0  ;;  %s1230_s0 = inlined_call_operand.hbm [shape: f32[2,64,256], index: 0, kind: input, shape index: {}]   ;;  %s1231_s1 = inlined_call_operand.vmem [shape: f32[64,16], index: 1, kind: input, shape index: {}]   ;;  %s1232_s2 = inlined_call_operand.vmem [shape: f32[1,16], index: 2, kind: input, shape index: {}]   ;;  %s1233_s3 = inlined_call_operand.vmem [shape: f32[16,64], index: 3, kind: input, shape index: {}]   ;;  %s1234_s4 = inlined_call_operand.vmem [shape: f32[1,64], index: 4, kind: input, shape index: {}]   ;;  %s1235_s5 = inlined_call_operand.hbm [shape: f32[2,64,256], index: 5, kind: output, shape index: {}]  }
   0x1   :  { %12 = vsyncpa [#allocation3 + $0x1], 0 }
   0x2   :  { %13 = vsyncpa [#allocation4], 0 }
   0x3   :  { %15 = vsyncpa [#allocation4 + $0x1], 0  ;;  %s933_s18 = smov 0   ;;  %s935_s19 = smov 0  }
   0x4   :  { %s937_s20 = smov 0   ;;  %s939_s21 = smov 0  }
   0x5 LB: > { %s954_s22 = sadd.s32 4294967295, %s892_s21   ;;  %s672_s23 = sadd.s32 4294967294, %s892_s21   ;;  %s892_s21 = sphi %s939_s21, %s1248_s21   ;;  %s888_s20 = sphi %s937_s20, %s1247_s20   ;;  %s884_s19 = sphi %s935_s19, %s1246_s19   ;;  %s880_s18 = sphi %s933_s18, %s1245_s18  }
   0x6   : > { %s958_s24 = sadd.s32 1, %s892_s21   ;;  %s28_s25 = sadd.s32 1, %s888_s20 }
   0x7   : > { %s25_s26 = ssub.s32 %s892_s21, %s958_s24  ;;  %p35_p0 = scmp.ne.s32.totalorder %s888_s20, %s884_s19 }
   0x8   : > { %p26_p1 = scmp.eq.s32.totalorder %s25_s26, 0  ;;  %p36_p2 = scmp.eq.s32.totalorder %s892_s21, 0 }
   0x9   : > { %p41_p3 = scmp.ne.s32.totalorder %s884_s19, %s880_s18  ;;  %p42_p4 = scmp.eq.s32.totalorder %s954_s22, 0 }
   0xa   : > { %s970_s27 = scalar_select %p26_p1, %s888_s20, %s28_s25  }
   0xb   : > { %p972_p5 = por %p36_p2, %p35_p0  ;;  %p976_p6 = por %p42_p4, %p41_p3 }
   0xc   : > { %p149_p7 = scmp.eq.s32.totalorder %s954_s22, 1  ;;  %p155_p8 = scmp.eq.s32.totalorder %s672_s23, 1 }
   0xd   : > { %p755_p10 = scmp.lt.s32.totalorder %s892_s21, 2  ;;  %s187_s7 = sand.u32 1, %s888_s20  }
   0xe   : > { %p983_p11 = por %p149_p7, %p35_p0  ;;  %p987_p12 = por %p155_p8, %p41_p3 }
   0xf   : > { %s688_s8 = sshll.u32 %s892_s21, 11  ;;  %s675_s9 = sshll.u32 %s187_s7, 7 }
  0x10   : > { %s1239_s30 = scalar_select %p983_p11, 1, 0 }
  0x11   : > { %s1240_s6 = scalar_select %p987_p12, 1, 0 }
  0x12   : > { %s996_s12 = scalar_lea.hbm %s1230_s0, %s688_s8  ;;  %s191_s13 = scalar_lea.vmem [#allocation2], %s675_s9 }
  0x13   : > { %s198_s14 = sshll.u32 %s191_s13, 4  ;;  %p1000_p13 = pnand %p755_p10, %p972_p5  ;;  %s1004_s14 = int_to_ptr.vmem [resolvable:$true] %s198_s14 }
  0x14   : > { %s1006_s16 = scalar_lea.sflag [#allocation3], %s187_s7  ;;  %s796_s17 = scalar_lea.hbm %s996_s12, 2048 }
  0x15   : > { %p797_p0 = scmp.ne.s32.totalorder %s996_s12, %s796_s17  ;;  %p798_p1 = pneg %p1000_p13 }
  0x16   : > { %s801_s26 = scalar_lea.hbm %s1230_s0, 4096  ;;  %p802_p4 = scmp.lt.u32.totalorder %s996_s12, %s1230_s0 }
  0x17   : > { %p799_p2 = pnand %p798_p1, %p797_p0  ;;  %p803_p5 = scmp.lt.u32.totalorder %s801_s26, %s796_s17 }
  0x18   : > { %p805_p8 = scmp.lt.u32.totalorder %s796_s17, %s996_s12 }
  0x19   : > { %p800_p3 = pneg %p799_p2  ;;  %p804_p7 = por %p803_p5, %p802_p4 }
  0x1b   : > { %p806_p10 = por %p805_p8, %p804_p7 }
  0x1d   : > { %p807_p9 = pnand %p806_p10, %p800_p3 }
  0x1f   : > { %810 = shalt.err (!%p807_p9)
}
  0x20   : > { %s811_s7 = scalar_lea.vmem %s1004_s14, 2048  ;;  %s894_s9 = smov [#allocation2]  }
  0x21   : > { %p812_p0 = scmp.ne.s32.totalorder %s1004_s14, %s811_s7  ;;  %s816_s10 = sshll.u32 %s894_s9, 4  ;;  %s817_s10 = int_to_ptr.vmem [resolvable:$false] %s816_s10 }
  0x22   : > { %s818_s11 = scalar_lea.vmem %s817_s10, 4096  ;;  %p819_p11 = scmp.lt.s32.totalorder %s1004_s14, %s817_s10 }
  0x23   : > { %p814_p2 = pnand %p812_p0, %p798_p1  ;;  %p820_p4 = scmp.lt.s32.totalorder %s818_s11, %s811_s7 }
  0x25   : > { %p815_p12 = pneg %p814_p2  ;;  %p821_p5 = por %p820_p4, %p819_p11 }
  0x27   : > { %p822_p7 = pnand %p821_p5, %p815_p12 }
  0x29   : > { %825 = shalt.err (!%p822_p7)
}
  0x2a   : > { %s895_s13 = smov 256   ;;  %s896_s17 = smov 16  }
  0x2b   : > { %750 = dma.hbm_to_vmem [thread:$0]  (!%p1000_p13), %s996_s12, 2048, %s1004_s14, %s1006_s16, %s895_s13, %s895_s13, %s896_s17  }
  0x2c   : > { %p678_p9 = scmp.ge.s32.totalorder %s892_s21, 1  ;;  %p206_p1 = scmp.lt.s32.totalorder %s892_s21, 3 }
  0x2e   : > { %p207_p3 = pnand %p678_p9, %p206_p1 }
  0x2f   : > { %s1037_s23 = sand.u32 (!%p207_p3), 1, %s884_s19  }
  0x30   : > { %210 = sbr.rel (%p207_p3) target bundleno = 807 (0x327), region = 40  ;;  %s679_s25 = sshll.u32 (!%p207_p3), %s1037_s23, 7 }
  0x31   : > { %s213_s26 = scalar_lea.sflag (!%p207_p3), [#allocation3], %s1037_s23  ;;  %s216_s28 = scalar_lea.vmem (!%p207_p3), [#allocation2], %s679_s25 }
  0x37   : > { %871 = dma.done.wait (%p976_p6), %s213_s26, 2048  }
  0x38   : > { %873 = vsyncadd (%p976_p6), %s213_s26, 4294965248  ;;  %v1047_v0 = vld [vmem:[%s216_s28] sm:$0xff]  ;;  %v1049_v1 = vld [vmem:[%s216_s28 + $0x8] sm:$0xff]  ;;  %v897_v27 = vmov 0.0|0.0   ;;  %vm898_vm0 = vmmov 0   ;;  %v899_v37 = vmov 0.0   ;;  %v308_v38 = vlaneseq }
  0x39   : > { %v1051_v2 = vld [vmem:[%s216_s28 + $0x20] sm:$0xff]  ;;  %v259_v3 = vadd.f32 %v1049_v1, %v1047_v0  ;;  %v1055_v4 = vld [vmem:[%s216_s28 + $0x28] sm:$0xff]  ;;  %v1057_v5 = vld [vmem:[%s216_s28 + $0x10] sm:$0xff]  ;;  %728 = vmatprep.subr.bf16.mxu0 %v897_v27  ;;  %740 = vmatprep.subr.bf16.mxu1 %v897_v27  ;;  %vm319_vm1 = vcmask 130112   ;;  %vm326_vm2 = vcmask 195712   ;;  %vm333_vm3 = vcmask 261312  }
  0x3a   : > { %v1059_v6 = vld [vmem:[%s216_s28 + $0x18] sm:$0xff]  ;;  %v265_v7 = vadd.f32 %v1055_v4, %v1051_v2  ;;  %v1063_v8 = vld [vmem:[%s216_s28 + $0x30] sm:$0xff]  ;;  %v1071_v12 = vld [vmem:[%s216_s28 + $0x40] sm:$0xff]  ;;  %718 = vmatprep.mubr.msk.f32.mxu0 %vm898_vm0, %v899_v37  ;;  %725 = vmatprep.mubr.msk.f32.mxu1 %vm898_vm0, %v899_v37  ;;  %v309_v39 = vand.u32 127, %v308_v38  ;;  %v1119_v40 = vshrl.u32 %v308_v38, 7  ;;  %vm340_vm4 = vcmask 326912  }
  0x3b   : > { %v1065_v9 = vld [vmem:[%s216_s28 + $0x38] sm:$0xff]  ;;  %260 = vadd.xlane.f32.xlu0 %v259_v3  ;;  %v262_v10 = vadd.f32 %v1059_v6, %v1057_v5  ;;  %v1073_v13 = vld [vmem:[%s216_s28 + $0x48] sm:$0xff]  ;;  %v1075_v14 = vld [vmem:[%s216_s28 + $0x50] sm:$0xff]  ;;  %vm347_vm5 = vcmask 392512   ;;  %vm354_vm6 = vcmask 458112   ;;  %vm361_vm7 = vcmask 523712  }
  0x3c   : > { %266 = vadd.xlane.f32.xlu1 %v265_v7  ;;  %v268_v11 = vadd.f32 %v1065_v9, %v1063_v8  ;;  %v1077_v15 = vld [vmem:[%s216_s28 + $0x58] sm:$0xff]  ;;  %v271_v16 = vadd.f32 %v1073_v13, %v1071_v12  ;;  %v1083_v18 = vld [vmem:[%s216_s28 + $0x60] sm:$0xff]  ;;  %v1085_v19 = vld [vmem:[%s216_s28 + $0x68] sm:$0xff]  ;;  %v314_v41 = vadd.s32 4294967288, %v309_v39  ;;  %v321_v43 = vadd.s32 4294967280, %v309_v39  ;;  %s1149_s13 = scalar_lea.vmem [#allocation5], %s679_s25 }
  0x3d   : > { %v274_v17 = vadd.f32 %v1077_v15, %v1075_v14  ;;  %v1087_v20 = vld [vmem:[%s216_s28 + $0x70] sm:$0xff]  ;;  %v1089_v21 = vld [vmem:[%s216_s28 + $0x78] sm:$0xff]  ;;  %v277_v22 = vadd.f32 %v1085_v19, %v1083_v18  ;;  %v291_v24 = vld [vmem:[%s1231_s1] sm:$0xff]  ;;  %v328_v44 = vadd.s32 4294967272, %v309_v39  ;;  %v312_v46 = vsub.s32 %v309_v39, %v1119_v40  ;;  %s689_s25 = sshll.u32 %s954_s22, 11  ;;  %s599_s17 = sshll.u32 %s1149_s13, 4  ;;  %s1182_s17 = int_to_ptr.vmem [resolvable:$true] %s599_s17 }
  0x3e   : > { %v280_v23 = vadd.f32 %v1089_v21, %v1087_v20  ;;  %v292_v25 = vld [vmem:[%s1231_s1 + $0x8] sm:$0xff]  ;;  %v293_v28 = vld [vmem:[%s1231_s1 + $0x10] sm:$0xff]  ;;  %v294_v29 = vld [vmem:[%s1231_s1 + $0x18] sm:$0xff]  ;;  %v317_v48 = vsub.s32 %v314_v41, %v1119_v40  ;;  %v335_v49 = vadd.s32 4294967264, %v309_v39  ;;  %v324_v50 = vsub.s32 %v321_v43, %v1119_v40  ;;  %s1180_s29 = scalar_lea.hbm %s1235_s5, %s689_s25  ;;  %s586_s22 = scalar_lea.sflag [#allocation4], %s1037_s23 }
  0x3f   : > { %263 = vadd.xlane.f32.xlu0 %v262_v10  ;;  %v729_v26 = vpack.c.bf16 %v292_v25, %v291_v24  ;;  %v732_v30 = vpack.c.bf16 %v294_v29, %v293_v28  ;;  %v295_v31 = vld [vmem:[%s1231_s1 + $0x20] sm:$0xff]  ;;  %v296_v32 = vld [vmem:[%s1231_s1 + $0x28] sm:$0xff]  ;;  %v297_v34 = vld [vmem:[%s1231_s1 + $0x30] sm:$0xff]  ;;  %v331_v53 = vsub.s32 %v328_v44, %v1119_v40  ;;  %v342_v54 = vadd.s32 4294967256, %v309_v39  ;;  %s826_s12 = scalar_lea.vmem %s1182_s17, 2048  ;;  %p1242_p11 = scmp.ne.s32.totalorder %s1239_s30, 0 }
  0x40   : > { %269 = vadd.xlane.f32.xlu1 %v268_v11  ;;  %v735_v33 = vpack.c.bf16 %v296_v32, %v295_v31  ;;  %v298_v35 = vld [vmem:[%s1231_s1 + $0x38] sm:$0xff]  ;;  %v338_v60 = vsub.s32 %v335_v49, %v1119_v40  ;;  %v349_v61 = vadd.s32 4294967248, %v309_v39  ;;  %v356_v10 = vadd.s32 4294967240, %v309_v39  ;;  %v437_v39 = vld [vmem:[%s1233_s3] sm:$0xff]  ;;  %v438_v41 = vld [vmem:[%s1233_s3 + $0x8] sm:$0xff]  ;;  %p827_p6 = scmp.ne.s32.totalorder %s1182_s17, %s826_s12  ;;  %s900_s14 = smov [#allocation5]  }
  0x41   : > { %730 = vmatpush3.bf16.msra.mxu0 %v729_v26  ;;  %v738_v36 = vpack.c.bf16 %v298_v35, %v297_v34  ;;  %v345_v7 = vsub.s32 %v342_v54, %v1119_v40  ;;  %vm363_vm8 = vcmask 523264   ;;  %v299_v43 = vld [vmem:[%s1232_s2] sm:$0x1]  ;;  %vm440_vm9 = vcmask 130048   ;;  %s830_s15 = sshll.u32 %s900_s14, 4  ;;  %s831_s15 = int_to_ptr.vmem [resolvable:$false] %s830_s15 }
  0x42   : > { %731 = vmatprep.subr.bf16.mxu0 %v897_v27  ;;  %v352_v26 = vsub.s32 %v349_v61, %v1119_v40  ;;  %v359_v29 = vsub.s32 %v356_v10, %v1119_v40  ;;  %p828_p12 = pnand %p827_p6, %p1242_p11  ;;  %s832_s16 = scalar_lea.vmem %s831_s15, 4096 }
  0x43   : > { %272 = vadd.xlane.f32.xlu0 %v271_v16  ;;  %p833_p8 = scmp.lt.s32.totalorder %s1182_s17, %s831_s15  ;;  %p834_p10 = scmp.lt.s32.totalorder %s832_s16, %s826_s12 }
  0x44   : > { %275 = vadd.xlane.f32.xlu1 %v274_v17  ;;  %p829_p13 = pneg %p828_p12 }
  0x45   : > { %733 = vmatpush3.bf16.msra.mxu0 %v732_v30  ;;  %p835_p0 = por %p834_p10, %p833_p8 }
  0x46   : > { %734 = vmatprep.subr.bf16.mxu0 %v897_v27 }
  0x47   : > { %278 = vadd.xlane.f32.xlu0 %v277_v22  ;;  %p836_p2 = pnand %p835_p0, %p829_p13 }
  0x48   : > { %281 = vadd.xlane.f32.xlu1 %v280_v23 }
  0x49   : > { %736 = vmatpush3.bf16.msra.mxu0 %v735_v33 }
  0x4a   : > { %737 = vmatprep.subr.bf16.mxu0 %v897_v27 }
  0x4d   : > { %739 = vmatpush3.bf16.msra.mxu0 %v738_v36 }
  0xc8   : > { %v261_v42 = vpop.xlane.xlu0 %260 }
  0xc9   : > { %v267_v45 = vpop.xlane.xlu1 %266  ;;  %v283_v47 = vmul.f32 0.00390625, %v261_v42  ;;  %v741_v42 = vpack.c.bf16 %v438_v41, %v437_v39 }
  0xca   : > { %v285_v51 = vmul.f32 0.00390625, %v267_v45 }
  0xcb   : > { %v313_v58 = vrot.slane %v283_v47, %v312_v46  ;;  %742 = vmatpush3.bf16.msra.mxu1 %v741_v42 }
  0xcc   : > { %v264_v52 = vpop.xlane.xlu0 %263  ;;  %v325_v62 = vrot.slane %v285_v51, %v324_v50 }
  0xcd   : > { %v284_v55 = vmul.f32 0.00390625, %v264_v52  ;;  %v270_v56 = vpop.xlane.xlu1 %269 }
  0xce   : > { %v286_v57 = vmul.f32 0.00390625, %v270_v56 }
  0xcf   : > { %v318_v59 = vrot.slane %v284_v55, %v317_v48  ;;  %v439_v48 = vld [vmem:[%s1234_s4] sm:$0x1]  ;;  %v520_v55 = vsub.s32 0, %v1119_v40 }
  0xd0   : > { %v332_v63 = vrot.slane %v286_v57, %v331_v53  ;;  %v273_v3 = vpop.xlane.xlu0 %272 }
  0xd1   : > { %v320_v11 = vsel %vm319_vm1, %v318_v59, %v313_v58  ;;  %v287_v16 = vmul.f32 0.00390625, %v273_v3  ;;  %v276_v17 = vpop.xlane.xlu1 %275 }
  0xd2   : > { %v327_v22 = vsel %vm326_vm2, %v325_v62, %v320_v11  ;;  %v288_v23 = vmul.f32 0.00390625, %v276_v17 }
  0xd3   : > { %v334_v24 = vsel %vm333_vm3, %v332_v63, %v327_v22  ;;  %v339_v25 = vrot.slane %v287_v16, %v338_v60 }
  0xd4   : > { %v346_v27 = vrot.slane %v288_v23, %v345_v7  ;;  %v279_v28 = vpop.xlane.xlu0 %278 }
  0xd5   : > { %v341_v30 = vsel %vm340_vm4, %v339_v25, %v334_v24  ;;  %v289_v31 = vmul.f32 0.00390625, %v279_v28  ;;  %v282_v32 = vpop.xlane.xlu1 %281 }
  0xd6   : > { %v290_v33 = vmul.f32 0.00390625, %v282_v32  ;;  %v348_v35 = vsel %vm347_vm5, %v346_v27, %v341_v30 }
  0xd7   : > { %v353_v34 = vrot.slane %v289_v31, %v352_v26 }
  0xd8   : > { %v360_v36 = vrot.slane %v290_v33, %v359_v29 }
  0xd9   : > { %v355_v37 = vsel %vm354_vm6, %v353_v34, %v348_v35 }
  0xda   : > { %v362_v38 = vsel %vm361_vm7, %v360_v36, %v355_v37 }
  0xdb   : > { %719 = vmatmul.mubr.msk.f32.vlgmr.msra.gmra.mrb[0].mxu0 %vm363_vm8, %v362_v38 }
 0x1ae   : > { %v432_v44 = vpop.f32.mrb[0].mxu0 }
 0x1af   : > { %v433_v45 = vadd.f32 %v432_v44, %v299_v43  ;;  %v720_v46 = vpop.f32.mrb[1].mxu0 }
 0x1b1   : > { %v436_v47 = vmax.f32 %v433_v45, 0.0 }
 0x1b3   : > { %726 = vmatmul.mubr.msk.f32.vlgmr.msra.gmra.mrb[0].mxu1 %vm440_vm9, %v436_v47 }
 0x286   : > { %v510_v49 = vpop.f32.mrb[0].mxu1 }
 0x287   : > { %v511_v50 = vadd.f32 %v510_v49, %v439_v48  ;;  %v727_v51 = vpop.f32.mrb[1].mxu1 }
 0x289   : > { %v514_v52 = vmul.f32 0.16666667, %v511_v50 }
 0x28b   : > { %v515_v53 = vadd.f32 0.5, %v514_v52 }
 0x28d   : > { %v516_v54 = vmax.f32 %v515_v53, 0.0 }
 0x28f   : > { %v517_v56 = vmin.f32 %v516_v54, 1.0 }
 0x291   : > { %v521_v57 = vrot.slane %v517_v56, %v520_v55 }
 0x293   : > { %527 = vbcast.lane.b32.xlu1 %v521_v57, 264  ;;  %523 = vbcast.lane.b32.xlu0 %v521_v57, 256 }
 0x297   : > { %531 = vbcast.lane.b32.xlu1 %v521_v57, 272  ;;  %539 = vbcast.lane.b32.xlu0 %v521_v57, 288 }
 0x29b   : > { %535 = vbcast.lane.b32.xlu1 %v521_v57, 280  ;;  %547 = vbcast.lane.b32.xlu0 %v521_v57, 304 }
 0x29f   : > { %543 = vbcast.lane.b32.xlu1 %v521_v57, 296 }
 0x2a3   : > { %551 = vbcast.lane.b32.xlu1 %v521_v57, 312 }
 0x305   : > { %v528_v58 = vpop.permute.xlu1 %527  ;;  %v524_v59 = vpop.permute.xlu0 %523 }
 0x306   : > { %v555_v60 = vmul.f32 %v528_v58, %v1057_v5  ;;  %v556_v61 = vmul.f32 %v528_v58, %v1059_v6  ;;  %v553_v62 = vmul.f32 %v524_v59, %v1047_v0  ;;  %v554_v40 = vmul.f32 %v524_v59, %v1049_v1 }
 0x308   : > { %571 = vst [vmem:[%s1149_s13 + $0x10] sm:$0xff] %v555_v60  ;;  %572 = vst [vmem:[%s1149_s13 + $0x18] sm:$0xff] %v556_v61 }
 0x309   : > { %569 = vst [vmem:[%s1149_s13] sm:$0xff] %v553_v62  ;;  %570 = vst [vmem:[%s1149_s13 + $0x8] sm:$0xff] %v554_v40  ;;  %v532_v5 = vpop.permute.xlu1 %531  ;;  %v540_v0 = vpop.permute.xlu0 %539 }
 0x30a   : > { %v557_v1 = vmul.f32 %v532_v5, %v1051_v2  ;;  %v558_v6 = vmul.f32 %v532_v5, %v1055_v4  ;;  %v561_v63 = vmul.f32 %v540_v0, %v1071_v12  ;;  %v562_v3 = vmul.f32 %v540_v0, %v1073_v13 }
 0x30c   : > { %573 = vst [vmem:[%s1149_s13 + $0x20] sm:$0xff] %v557_v1  ;;  %574 = vst [vmem:[%s1149_s13 + $0x28] sm:$0xff] %v558_v6 }
 0x30d   : > { %577 = vst [vmem:[%s1149_s13 + $0x40] sm:$0xff] %v561_v63  ;;  %578 = vst [vmem:[%s1149_s13 + $0x48] sm:$0xff] %v562_v3  ;;  %v536_v7 = vpop.permute.xlu1 %535  ;;  %v548_v10 = vpop.permute.xlu0 %547 }
 0x30e   : > { %v559_v2 = vmul.f32 %v536_v7, %v1063_v8  ;;  %v560_v11 = vmul.f32 %v536_v7, %v1065_v9  ;;  %v565_v4 = vmul.f32 %v548_v10, %v1083_v18  ;;  %v566_v12 = vmul.f32 %v548_v10, %v1085_v19 }
 0x310   : > { %575 = vst [vmem:[%s1149_s13 + $0x30] sm:$0xff] %v559_v2  ;;  %576 = vst [vmem:[%s1149_s13 + $0x38] sm:$0xff] %v560_v11 }
 0x311   : > { %581 = vst [vmem:[%s1149_s13 + $0x60] sm:$0xff] %v565_v4  ;;  %582 = vst [vmem:[%s1149_s13 + $0x68] sm:$0xff] %v566_v12  ;;  %v544_v13 = vpop.permute.xlu1 %543 }
 0x312   : > { %v563_v16 = vmul.f32 %v544_v13, %v1075_v14  ;;  %v564_v17 = vmul.f32 %v544_v13, %v1077_v15 }
 0x314   : > { %579 = vst [vmem:[%s1149_s13 + $0x50] sm:$0xff] %v563_v16  ;;  %580 = vst [vmem:[%s1149_s13 + $0x58] sm:$0xff] %v564_v17 }
 0x315   : > { %v552_v8 = vpop.permute.xlu1 %551 }
 0x316   : > { %v567_v9 = vmul.f32 %v552_v8, %v1087_v20  ;;  %v568_v14 = vmul.f32 %v552_v8, %v1089_v21 }
 0x318   : > { %583 = vst [vmem:[%s1149_s13 + $0x70] sm:$0xff] %v567_v9  ;;  %584 = vst [vmem:[%s1149_s13 + $0x78] sm:$0xff] %v568_v14 }
 0x319   : > { %839 = shalt.err (!%p836_p2)
}
 0x31a   : > { %s840_s8 = scalar_lea.hbm %s1180_s29, 2048  ;;  %s844_s10 = scalar_lea.hbm %s1235_s5, 4096 }
 0x31b   : > { %p841_p4 = scmp.ne.s32.totalorder %s1180_s29, %s840_s8  ;;  %p845_p9 = scmp.lt.u32.totalorder %s1180_s29, %s1235_s5 }
 0x31c   : > { %p846_p1 = scmp.lt.u32.totalorder %s844_s10, %s840_s8  ;;  %p848_p6 = scmp.lt.u32.totalorder %s840_s8, %s1180_s29 }
 0x31d   : > { %p842_p5 = pnand %p841_p4, %p1242_p11 }
 0x31e   : > { %p847_p3 = por %p846_p1, %p845_p9 }
 0x31f   : > { %p843_p7 = pneg %p842_p5 }
 0x320   : > { %p849_p12 = por %p848_p6, %p847_p3 }
 0x322   : > { %p850_p13 = pnand %p849_p12, %p843_p7 }
 0x324   : > { %853 = shalt.err (!%p850_p13)
}
 0x325   : > { %s901_s25 = smov 256   ;;  %s902_s26 = smov 16  }
 0x326   : > { %745 = dma.vmem_to_hbm [thread:$0]  (%p1242_p11), %s1182_s17, 2048, %s1180_s29, %s586_s22, %s901_s25, %s901_s25, %s902_s26  }
 0x327 PF: > { %s614_s28 = sand.u32 1, %s880_s18   ;;  %p1243_p8 = scmp.ne.s32.totalorder %s1240_s6, 0 }
 0x328   : > { %p1244_p10 = scmp.ge.s32.totalorder %s892_s21, 2  ;;  %s615_s12 = scalar_lea.sflag [#allocation4], %s614_s28 }
 0x32a   : > { %p752_p0 = pnand %p1244_p10, %p1243_p8 }
 0x32c   : > { %875 = dma.done.wait (!%p752_p0), %s615_s12, 2048  }
 0x32d   : > { %877 = vsyncadd (!%p752_p0), %s615_s12, 4294965248  ;;  %p18_p2 = scmp.ge.s32.totalorder %s958_s24, 4   ;;  %s1245_s18 = smov %s884_s19 }
 0x32e   : > { %s1246_s19 = smov %s888_s20  ;;  %s1247_s20 = smov %s970_s27 }
 0x32f   : > { %s1248_s21 = smov %s958_s24  ;;  %20 = sbr.rel (!%p18_p2) target bundleno = 5 (0x5), region = 85 }
 0x336   :  { %620 = vsyncpa [#allocation3], 1 }
 0x337   :  { %622 = vsyncpa [#allocation3 + $0x1], 1 }
 0x338   :  { %623 = vsyncpa [#allocation4], 1 }
 0x339   :  { %625 = vsyncpa [#allocation4 + $0x1], 1 }

</bundles_post_ra>
